<compile_context>
chip_gen: v5e
topology: v5e:2x2
jax: 0.10.0
libtpu: 0.0.40
codegen_flags: <defaults>
</compile_context>

<pallas_src>
import jax
import jax.numpy as jnp
from jax import lax
from jax.experimental import pallas as pl
from jax.experimental.pallas import tpu as pltpu


def build_diffusion_matrix(adj, n_steps=1, lazy_rate=0.5):
    """Mirrors GraphSmoothLayer.__init__ / _get_diffusion_matrix exactly."""
    adj = adj.astype(jnp.float32)
    n = adj.shape[0]
    # adj_matrix.fill_diagonal_(1)
    adj = adj.at[jnp.arange(n), jnp.arange(n)].set(1.0)
    deg = adj.sum(axis=1, keepdims=True)
    transition = adj / deg
    identity = jnp.eye(n, dtype=adj.dtype)
    diffusion = lazy_rate * identity + (1.0 - lazy_rate) * transition
    if n_steps > 1:
        # torch.matrix_power(n_steps) semantics: D^n_steps.
        power = jnp.eye(n, dtype=diffusion.dtype)
        for _ in range(int(n_steps)):
            power = jnp.dot(power, diffusion)
        diffusion = power
    return diffusion


def _make_kernel(n_nodes):
    def kernel(h_ref, d_ref, o_ref):
        h = h_ref[...]                                    # (TB, F)
        # Single MXU pass against block_diag(D, I): implements the full
        # slice + mm + concat of the reference module in one shot.
        y = jnp.dot(h, d_ref[...], preferred_element_type=jnp.float32)
        # Force the passthrough columns (>= N) to be a bit-exact copy of h,
        # independent of MXU precision.  Cheap VPU select; one lane-dense,
        # full-width store.
        col = lax.broadcasted_iota(jnp.int32, y.shape, dimension=1)
        out = jnp.where(col < n_nodes, y, h.astype(jnp.float32))
        o_ref[...] = out.astype(o_ref.dtype)
    return kernel


def graph_smooth(h, diffusion_matrix, *, block_rows=None):
    """out = concat(h[:, :N] @ D, h[:, N:]), computed in a single Pallas call."""
    B, F = h.shape
    N = diffusion_matrix.shape[0]
    assert diffusion_matrix.shape == (N, N)
    assert F >= N

    # Block-diagonal [[D, 0], [0, I_{F-N}]]: fuses the concat into the matmul.
    d_full = jnp.zeros((F, F), dtype=h.dtype)
    d_full = d_full.at[:N, :N].set(diffusion_matrix.astype(h.dtype))
    if F > N:
        d_full = d_full.at[N:, N:].set(jnp.eye(F - N, dtype=h.dtype))

    itemsize = jnp.dtype(h.dtype).itemsize

    # Batch tile: multiple of 8 sublanes; sized so the double-buffered input +
    # output tiles (2 bufs each) plus the resident D stay far below the
    # smallest scoped-VMEM default (v7x).
    if block_rows is None:
        bytes_per_row = 2 * F * itemsize          # one input row + one output row
        budget = 8 * 1024 * 1024                  # ~8 MiB per (in, out) tile pair
        tb = max(8, min(1024, budget // max(bytes_per_row, 1)))
        tb = (tb // 8) * 8
        block_rows = min(tb, max(8, ((B + 7) // 8) * 8))
    TB = int(block_rows)

    kernel = _make_kernel(N)

    cost = pl.CostEstimate(
        flops=2 * B * F * F,
        transcendentals=0,
        bytes_accessed=(2 * B * F + F * F) * itemsize,
    )

    return pl.pallas_call(
        kernel,
        out_shape=jax.ShapeDtypeStruct((B, F), h.dtype),
        grid=(pl.cdiv(B, TB),),
        in_specs=[
            pl.BlockSpec((TB, F), lambda i: (i, 0)),     # streamed over batch
            pl.BlockSpec((F, F), lambda i: (0, 0)),      # VMEM-resident D_full
        ],
        out_specs=pl.BlockSpec((TB, F), lambda i: (i, 0)),
        compiler_params=pltpu.CompilerParams(
            dimension_semantics=("parallel",),           # megacore on v7x
        ),
        cost_estimate=cost,
    )(h, d_full)


if __name__ == "__main__":
    key = jax.random.PRNGKey(0)
    k_adj, k_h = jax.random.split(key)

    # Small demo shapes consistent with the module: N graph nodes smoothed,
    # F - N passthrough features, B sample rows.
    N = 16
    B = 8
    F = 32
    n_steps = 1
    lazy_rate = 0.5

    # Deterministic synthetic 0/1 adjacency; diagonal forced to 1 in the builder.
    adj = (jax.random.uniform(k_adj, (N, N)) > 0.5).astype(jnp.float32)
    diffusion = build_diffusion_matrix(adj, n_steps=n_steps, lazy_rate=lazy_rate)

    h = jax.random.normal(k_h, (B, F), dtype=jnp.float32)

    out = graph_smooth(h, diffusion)
    out = jax.block_until_ready(out)

    # Plain-JAX reference with the torch module's semantics.
    ref = jnp.concatenate([jnp.dot(h[:, :N], diffusion), h[:, N:]], axis=-1)
    assert out.shape == (B, F)
    assert jnp.allclose(out, ref, atol=1e-5, rtol=1e-5), "mismatch vs reference"

    print("KERNEL_OK")
</pallas_src>

<mosaic_0001>
module attributes {stable_mosaic.version = 11 : i64} {
  func.func @kernel(%arg0: i32, %arg1: memref<8x32xf32, #tpu.memory_space<vmem>>, %arg2: memref<32x32xf32, #tpu.memory_space<vmem>>, %arg3: memref<8x32xf32, #tpu.memory_space<vmem>>) attributes {dimension_semantics = [#tpu.dimension_semantics<parallel>], iteration_bounds = array<i64: 1>, scalar_prefetch = 0 : i64, scratch_operands = 0 : i64, tpu.core_type = #tpu.core_type<tc>, window_params = [{transform_indices = @transform_0, window_bounds = array<i64: 8, 32>}, {pipeline_mode = #tpu.pipeline_mode<synchronous>, transform_indices = @transform_1, window_bounds = array<i64: 32, 32>}, {transform_indices = @transform_2, window_bounds = array<i64: 8, 32>}]} {
    %c0 = arith.constant 0 : index
    %c0_0 = arith.constant 0 : index
    %0 = vector.load %arg1[%c0, %c0_0] : memref<8x32xf32, #tpu.memory_space<vmem>>, vector<8x32xf32>
    %c0_1 = arith.constant 0 : index
    %c0_2 = arith.constant 0 : index
    %1 = vector.load %arg2[%c0_1, %c0_2] : memref<32x32xf32, #tpu.memory_space<vmem>>, vector<32x32xf32>
    %cst = arith.constant dense<0.000000e+00> : vector<8x32xf32>
    %2 = tpu.matmul %0, %1, %cst {dimension_numbers = #tpu.dot_dimension_numbers<[1], [0], [0], [1], [0, 0, 1, 1], [], []>} : vector<8x32xf32>, vector<32x32xf32>, vector<8x32xf32> -> vector<8x32xf32>
    %3 = tpu.iota {dimensions = array<i32: 1>} : vector<8x32xi32>
    %c16_i32 = arith.constant 16 : i32
    %4 = vector.broadcast %c16_i32 : i32 to vector<8x32xi32>
    %5 = arith.cmpi slt, %3, %4 : vector<8x32xi32>
    %6 = arith.select %5, %2, %0 : vector<8x32xi1>, vector<8x32xf32>
    %c0_3 = arith.constant 0 : index
    %c0_4 = arith.constant 0 : index
    %7 = vector.load %arg3[%c0_3, %c0_4] : memref<8x32xf32, #tpu.memory_space<vmem>>, vector<8x32xf32>
    tpu.vector_store %arg3[%c0_3, %c0_4], %6 {strides = array<i32>} : memref<8x32xf32, #tpu.memory_space<vmem>>, vector<8x32xf32>,
    return
  }
  func.func @transform_0(%arg0: i32) -> (i32, i32) {
    %c0_i32 = arith.constant 0 : i32
    %c0_i32_0 = arith.constant 0 : i32
    return %arg0, %c0_i32 : i32, i32
  }
  func.func @transform_1(%arg0: i32) -> (i32, i32) {
    %c0_i32 = arith.constant 0 : i32
    %c0_i32_0 = arith.constant 0 : i32
    %c0_i32_1 = arith.constant 0 : i32
    return %c0_i32, %c0_i32_0 : i32, i32
  }
  func.func @transform_2(%arg0: i32) -> (i32, i32) {
    %c0_i32 = arith.constant 0 : i32
    %c0_i32_0 = arith.constant 0 : i32
    return %arg0, %c0_i32 : i32, i32
  }
}

</mosaic_0001>

<bundles_post_ra>
// kernel: tpu_custom_call.1
= control target key start
LH: loop header
LB: loop body
LE: loop exit
PB: predicated region body
PF: predicated region fallthrough
CT: control target
= control target key end

     0   :  { %7 = vsyncpa [#allocation3], 0  ;;  %s207_s0 = inlined_call_operand.hbm [shape: f32[8,32], index: 0, kind: input, shape index: {}]   ;;  %s208_s1 = inlined_call_operand.hbm [shape: f32[32,32], index: 1, kind: input, shape index: {}]   ;;  %s209_s2 = inlined_call_operand.hbm [shape: f32[8,32], index: 2, kind: output, shape index: {}]  }
   0x1   :  { %8 = vsyncpa [#allocation6], 0 }
   0x2   :  { %9 = vsyncpa [#allocation4], 0  ;;  %s15_s11 = sshll.u32 %s207_s0, 4  ;;  %s178_s12 = smov [#allocation2]   ;;  %s16_s11 = int_to_ptr.hbm [resolvable:$true] %s15_s11 }
   0x3   :  { %s17_s13 = sshll.u32 %s178_s12, 4  ;;  %s25_s16 = sshll.u32 %s208_s1, 4  ;;  %s18_s13 = int_to_ptr.vmem [resolvable:$true] %s17_s13  ;;  %s26_s16 = int_to_ptr.hbm [resolvable:$true] %s25_s16 }
   0x4   :  { %20 = dma.hbm_to_vmem [thread:$0]  %s16_s11, 128, %s18_s13, [#allocation3]  }
   0x5   :  { %s179_s17 = smov [#allocation5]   ;;  %s180_s19 = smov 128  }
   0x6   :  { %s27_s18 = sshll.u32 %s179_s17, 4  ;;  %s181_s20 = smov 8   ;;  %s28_s18 = int_to_ptr.vmem [resolvable:$true] %s27_s18 }
   0x7   :  { %33 = dma.hbm_to_vmem [thread:$0]  %s26_s16, 512, %s28_s18, [#allocation6], %s180_s19, %s180_s19, %s181_s20  }
   0x8   :  { %172 = dma.done.wait [#allocation3], 128  }
   0x9   :  { %173 = vsyncadd [#allocation3], 4294967168 }
   0xa   :  { %174 = dma.done.wait [#allocation6], 512  }
   0xb   :  { %175 = vsyncadd [#allocation6], 4294966784  ;;  %v46_v0 = vld [vmem:[#allocation5 + $0x18] sm:$0xff]  ;;  %v45_v1 = vld [vmem:[#allocation5 + $0x10] sm:$0xff]  ;;  %vm47_vm0 = vcmask 261120   ;;  %v71_v5 = vlaneseq  ;;  %s182_s0 = smov [#allocation7]  }
   0xc   :  { %63 = vmatpush.msra.mxu0 %v46_v0  ;;  %v44_v2 = vld [vmem:[#allocation5 + $0x8] sm:$0xff]  ;;  %v43_v3 = vld [vmem:[#allocation5] sm:$0xff]  ;;  %v42_v4 = vld [vmem:[#allocation2] sm:$0xff]  ;;  %s81_s1 = sshll.u32 %s182_s0, 4  ;;  %s83_s23 = sshll.u32 %s209_s2, 4  ;;  %s82_s1 = int_to_ptr.vmem [resolvable:$true] %s81_s1  ;;  %s84_s23 = int_to_ptr.hbm [resolvable:$true] %s83_s23 }
   0xd   :  { %v72_v6 = vand.u32 127, %v71_v5 }
   0xe   :  { %64 = vmatpush.msra.mxu0 %v45_v1 }
   0xf   :  { %vm73_vm1 = vcmp.lt.s32.totalorder %v72_v6, 16 }
  0x10   :  { %65 = vmatpush.msra.mxu0 %v44_v2 }
  0x12   :  { %66 = vmatpush.msra.mxu0 %v43_v3 }
  0x13   :  { %94 = vmatmul.msk.f32.vlgmr.msra.gmra.mxu0 %vm47_vm0, %v42_v4 }
  0x90   :  { %v68_v7 = vpop.f32.mrf.mxu0 }
  0x91   :  { %v74_v8 = vsel %vm73_vm1, %v68_v7, %v42_v4 }
  0x92   :  { %75 = vst.msk [vmem:[#allocation7] sm:$0xff] %vm47_vm0, %v74_v8 }
  0x93   :  { %86 = dma.vmem_to_hbm [thread:$0]  %s82_s1, 128, %s84_s23, [#allocation4]  }
  0x94   :  { %176 = dma.done.wait [#allocation4], 128  }
  0x95   :  { %177 = vsyncadd [#allocation4], 4294967168 }
  0x96   :  { %91 = vsyncpa [#allocation3], 1 }
  0x97   :  { %92 = vsyncpa [#allocation6], 1 }
  0x98   :  { %93 = vsyncpa [#allocation4], 1 }

</bundles_post_ra>
